<compile_context>
chip_gen: v7x
topology: tpu7x:2x2x1
jax: 0.10.0
libtpu: 0.0.40
codegen_flags: <defaults>
</compile_context>

<pallas_src>
import jax
import jax.numpy as jnp
from jax import lax
from jax.experimental import pallas as pl
from jax.experimental.pallas import tpu as pltpu


# ----------------------------------------------------------------------------
# Pass 1: accumulate channel-attention scores over N-tiles, softmax at the end.
# ----------------------------------------------------------------------------
def _scores_softmax_kernel(x_ref, wqk_ref, bqk_ref, attn_ref, s_acc):
    nt = pl.program_id(1)

    @pl.when(nt == 0)
    def _():
        s_acc[...] = jnp.zeros_like(s_acc)

    C = attn_ref.shape[-1]
    x = x_ref[0]                                             # (C, tn)

    # Fused q/k projection: one MXU matmul instead of two (better M occupancy).
    qk = jnp.dot(wqk_ref[...], x,
                 preferred_element_type=jnp.float32) + bqk_ref[...]   # (2C, tn)
    q = qk[:C]                                               # (C, tn)
    k = qk[C:]                                               # (C, tn)

    # scores += q @ k^T : contract the lane (N) axis directly, no transpose.
    s_acc[...] += lax.dot_general(
        q, k, dimension_numbers=(((1,), (1,)), ((), ())),
        preferred_element_type=jnp.float32)

    @pl.when(nt == pl.num_programs(1) - 1)
    def _():
        s = s_acc[...]
        s = s - jnp.max(s, axis=-1, keepdims=True)
        e = jnp.exp(s)
        # approx=False keeps the tight tolerance vs. the reference; the softmax
        # runs only once per batch element on a (C, C) block, so it is cheap.
        denom = pl.reciprocal(jnp.sum(e, axis=-1, keepdims=True), approx=False)
        attn_ref[0] = (e * denom).astype(attn_ref.dtype)


# ----------------------------------------------------------------------------
# Pass 2: per N-tile, recompute v and write gamma * (attn @ v) + x.
# ----------------------------------------------------------------------------
def _attn_output_kernel(x_ref, wv_ref, bv_ref, attn_ref, gamma_ref, o_ref):
    x = x_ref[0]                                             # (C, tn)
    v = jnp.dot(wv_ref[...], x,
                preferred_element_type=jnp.float32) + bv_ref[...]     # (C, tn)
    attn = attn_ref[0]                                       # (C, C)
    out = jnp.dot(attn, v, preferred_element_type=jnp.float32)
    gamma = gamma_ref[0]                                     # scalar from SMEM
    o_ref[0] = (gamma * out + x).astype(o_ref.dtype)


def _pick_n_tile(n, c):
    """Largest multiple-of-128 divisor of n, capped so a (c, tn) f32 tile is
    roughly <= 2 MiB (keeps double-buffering comfortable on v7x's 64 MiB VMEM
    while still >= 512 lanes when possible)."""
    if n % 128 != 0:
        return n  # full axis as a single block (allowed: equals array dim)
    cap_elems = min(8192, max(512, ((2 * 1024 * 1024) // (4 * c)) // 128 * 128))
    cap = min(n, cap_elems)
    best = 128
    for t in range(128, cap + 1, 128):
        if n % t == 0:
            best = t
    return best


def self_attention(x, wq, bq, wk, bk, wv, bv, gamma, *, n_tile=None):
    """x: (B, C, D, H, W) float32.  Returns same shape/dtype."""
    B, C, D, H, W = x.shape
    N = D * H * W
    xf = x.reshape(B, C, N)

    tn = n_tile if n_tile is not None else _pick_n_tile(N, C)
    assert N % tn == 0, "N tile must evenly divide D*H*W"
    NT = N // tn

    # Fuse the q/k projection weights; biases as (rows, 1) for broadcasting.
    wqk = jnp.concatenate([wq, wk], axis=0)                  # (2C, C)
    bqk = jnp.concatenate([bq, bk], axis=0).reshape(2 * C, 1)
    bv2 = bv.reshape(C, 1)
    gamma1 = gamma.reshape(1).astype(jnp.float32)            # scalar -> SMEM

    vmem_limit = 48 * 1024 * 1024  # explicit; safe on v5e/v6e/v7x

    # --- Pass 1: (B, C, C) attention weights ---------------------------------
    attn = pl.pallas_call(
        _scores_softmax_kernel,
        out_shape=jax.ShapeDtypeStruct((B, C, C), jnp.float32),
        grid_spec=pltpu.PrefetchScalarGridSpec(
            num_scalar_prefetch=0,
            grid=(B, NT),
            in_specs=[
                pl.BlockSpec((1, C, tn), lambda b, n: (b, 0, n)),   # x tile
                pl.BlockSpec((2 * C, C), lambda b, n: (0, 0)),      # Wqk
                pl.BlockSpec((2 * C, 1), lambda b, n: (0, 0)),      # bqk
            ],
            out_specs=pl.BlockSpec((1, C, C), lambda b, n: (b, 0, 0)),
            scratch_shapes=[pltpu.VMEM((C, C), jnp.float32)],
        ),
        compiler_params=pltpu.CompilerParams(
            dimension_semantics=("parallel", "arbitrary"),
            vmem_limit_bytes=vmem_limit),
    )(xf, wqk, bqk)

    # --- Pass 2: attention-weighted values + residual ------------------------
    out_flat = pl.pallas_call(
        _attn_output_kernel,
        out_shape=jax.ShapeDtypeStruct((B, C, N), x.dtype),
        grid_spec=pltpu.PrefetchScalarGridSpec(
            num_scalar_prefetch=0,
            grid=(B, NT),
            in_specs=[
                pl.BlockSpec((1, C, tn), lambda b, n: (b, 0, n)),   # x tile
                pl.BlockSpec((C, C), lambda b, n: (0, 0)),          # Wv
                pl.BlockSpec((C, 1), lambda b, n: (0, 0)),          # bv
                pl.BlockSpec((1, C, C), lambda b, n: (b, 0, 0)),    # attn
                pl.BlockSpec(memory_space=pltpu.MemorySpace.SMEM),  # gamma
            ],
            out_specs=pl.BlockSpec((1, C, tn), lambda b, n: (b, 0, n)),
        ),
        compiler_params=pltpu.CompilerParams(
            dimension_semantics=("parallel", "parallel"),
            vmem_limit_bytes=vmem_limit),
    )(xf, wv, bv2, attn, gamma1)

    return out_flat.reshape(B, C, D, H, W)


def self_attention_ref(x, wq, bq, wk, bk, wv, bv, gamma):
    """Pure-JAX reference matching the PyTorch forward."""
    B, C, D, H, W = x.shape
    N = D * H * W
    xf = x.reshape(B, C, N)
    q = jnp.einsum("oc,bcn->bon", wq, xf) + bq[None, :, None]
    k = jnp.einsum("oc,bcn->bon", wk, xf) + bk[None, :, None]
    v = jnp.einsum("oc,bcn->bon", wv, xf) + bv[None, :, None]
    scores = jnp.einsum("bcn,bdn->bcd", q, k)
    attn = jax.nn.softmax(scores, axis=-1)
    out = jnp.einsum("bcd,bdn->bcn", attn, v)
    return (gamma * out + xf).reshape(B, C, D, H, W)


def _make_params(key, C):
    kq, kk, kv, kbq, kbk, kbv = jax.random.split(key, 6)
    scale = 1.0 / jnp.sqrt(jnp.float32(C))
    wq = jax.random.uniform(kq, (C, C), jnp.float32, -scale, scale)
    wk = jax.random.uniform(kk, (C, C), jnp.float32, -scale, scale)
    wv = jax.random.uniform(kv, (C, C), jnp.float32, -scale, scale)
    bq = jax.random.uniform(kbq, (C,), jnp.float32, -scale, scale)
    bk = jax.random.uniform(kbk, (C,), jnp.float32, -scale, scale)
    bv = jax.random.uniform(kbv, (C,), jnp.float32, -scale, scale)
    return wq, bq, wk, bk, wv, bv


if __name__ == "__main__":
    key = jax.random.PRNGKey(0)

    # (B, C, D, H, W, explicit n_tile)
    cases = [
        (2, 4, 4, 4, 8, None),   # N = 128: single N tile
        (2, 4, 4, 8, 8, 128),    # N = 256, tn = 128: exercises the score
                                 # accumulation across N-tiles (two pass-1 steps)
    ]

    for (B, C, D, H, W, ntile) in cases:
        case_key = jax.random.fold_in(key, D * H * W)
        kx, kp = jax.random.split(case_key)
        x = jax.random.normal(kx, (B, C, D, H, W), dtype=jnp.float32)
        wq, bq, wk, bk, wv, bv = _make_params(kp, C)

        # Module __init__ sets gamma = 0 (so out == x); also test non-zero gamma
        # to exercise the full attention path against the JAX reference.
        for gamma_val in (0.0, 0.7):
            gamma = jnp.array([gamma_val], dtype=jnp.float32)
            out = self_attention(x, wq, bq, wk, bk, wv, bv, gamma, n_tile=ntile)
            out = jax.block_until_ready(out)
            ref = self_attention_ref(x, wq, bq, wk, bk, wv, bv, gamma)
            assert out.shape == x.shape and out.dtype == x.dtype
            assert jnp.allclose(out, ref, atol=1e-4, rtol=1e-4), (
                f"mismatch at shape={(B, C, D, H, W)} gamma={gamma_val}")

    print("KERNEL_OK")
</pallas_src>

<mosaic_0001>
module attributes {stable_mosaic.version = 11 : i64} {
  func.func @_scores_softmax_kernel(%arg0: i32, %arg1: i32, %arg2: memref<1x4x128xf32, #tpu.memory_space<vmem>>, %arg3: memref<8x4xf32, #tpu.memory_space<vmem>>, %arg4: memref<8x1xf32, #tpu.memory_space<vmem>>, %arg5: memref<1x4x4xf32, #tpu.memory_space<vmem>>, %arg6: memref<4x4xf32, #tpu.memory_space<vmem>>) attributes {dimension_semantics = [#tpu.dimension_semantics<parallel>, #tpu.dimension_semantics<arbitrary>], iteration_bounds = array<i64: 2, 1>, scalar_prefetch = 0 : i64, scratch_operands = 1 : i64, tpu.core_type = #tpu.core_type<tc>, window_params = [{transform_indices = @transform_0, window_bounds = array<i64: 1, 4, 128>}, {pipeline_mode = #tpu.pipeline_mode<synchronous>, transform_indices = @transform_1, window_bounds = array<i64: 8, 4>}, {pipeline_mode = #tpu.pipeline_mode<synchronous>, transform_indices = @transform_2, window_bounds = array<i64: 8, 1>}, {transform_indices = @transform_3, window_bounds = array<i64: 1, 4, 4>}]} {
    %c0_i32 = arith.constant 0 : i32
    %0 = arith.cmpi eq, %arg1, %c0_i32 : i32
    %1 = arith.extui %0 : i1 to i32
    %c0_i32_0 = arith.constant 0 : i32
    %2 = arith.cmpi ne, %1, %c0_i32_0 : i32
    scf.if %2 {
      %cst_14 = arith.constant 0.000000e+00 : f32
      %19 = vector.broadcast %cst_14 : f32 to vector<4x4xf32>
      %c0_15 = arith.constant 0 : index
      %c0_16 = arith.constant 0 : index
      %20 = vector.load %arg6[%c0_15, %c0_16] : memref<4x4xf32, #tpu.memory_space<vmem>>, vector<4x4xf32>
      tpu.vector_store %arg6[%c0_15, %c0_16], %19 {strides = array<i32>} : memref<4x4xf32, #tpu.memory_space<vmem>>, vector<4x4xf32>,
    } else {
    }
    %c0 = arith.constant 0 : index
    %c0_1 = arith.constant 0 : index
    %c0_2 = arith.constant 0 : index
    %3 = vector.load %arg2[%c0, %c0_1, %c0_2] : memref<1x4x128xf32, #tpu.memory_space<vmem>>, vector<1x4x128xf32>
    %4 = vector.shape_cast %3 : vector<1x4x128xf32> to vector<4x128xf32>
    %c0_3 = arith.constant 0 : index
    %c0_4 = arith.constant 0 : index
    %5 = vector.load %arg3[%c0_3, %c0_4] : memref<8x4xf32, #tpu.memory_space<vmem>>, vector<8x4xf32>
    %cst = arith.constant dense<0.000000e+00> : vector<8x128xf32>
    %6 = tpu.matmul %5, %4, %cst {dimension_numbers = #tpu.dot_dimension_numbers<[1], [0], [0], [1], [0, 0, 1, 1], [], []>} : vector<8x4xf32>, vector<4x128xf32>, vector<8x128xf32> -> vector<8x128xf32>
    %c0_5 = arith.constant 0 : index
    %c0_6 = arith.constant 0 : index
    %7 = vector.load %arg4[%c0_5, %c0_6] : memref<8x1xf32, #tpu.memory_space<vmem>>, vector<8x1xf32>
    %8 = vector.broadcast %7 : vector<8x1xf32> to vector<8x128xf32>
    %9 = arith.addf %6, %8 : vector<8x128xf32>
    %10 = vector.extract_strided_slice %9 {offsets = [0, 0], sizes = [4, 128], strides = [1, 1]} : vector<8x128xf32> to vector<4x128xf32>
    %11 = vector.extract_strided_slice %9 {offsets = [4, 0], sizes = [4, 128], strides = [1, 1]} : vector<8x128xf32> to vector<4x128xf32>
    %c0_7 = arith.constant 0 : index
    %c0_8 = arith.constant 0 : index
    %12 = vector.load %arg6[%c0_7, %c0_8] : memref<4x4xf32, #tpu.memory_space<vmem>>, vector<4x4xf32>
    %cst_9 = arith.constant dense<0.000000e+00> : vector<4x4xf32>
    %13 = tpu.matmul %10, %11, %cst_9 {dimension_numbers = #tpu.dot_dimension_numbers<[1], [1], [0], [0], [0, 0, 1, 0], [], []>} : vector<4x128xf32>, vector<4x128xf32>, vector<4x4xf32> -> vector<4x4xf32>
    %14 = arith.addf %12, %13 : vector<4x4xf32>
    %c0_10 = arith.constant 0 : index
    %c0_11 = arith.constant 0 : index
    %15 = vector.load %arg6[%c0_10, %c0_11] : memref<4x4xf32, #tpu.memory_space<vmem>>, vector<4x4xf32>
    tpu.vector_store %arg6[%c0_10, %c0_11], %14 {strides = array<i32>} : memref<4x4xf32, #tpu.memory_space<vmem>>, vector<4x4xf32>,
    %c0_i32_12 = arith.constant 0 : i32
    %16 = arith.cmpi eq, %arg1, %c0_i32_12 : i32
    %17 = arith.extui %16 : i1 to i32
    %c0_i32_13 = arith.constant 0 : i32
    %18 = arith.cmpi ne, %17, %c0_i32_13 : i32
    scf.if %18 {
      %c0_14 = arith.constant 0 : index
      %c0_15 = arith.constant 0 : index
      %19 = vector.load %arg6[%c0_14, %c0_15] : memref<4x4xf32, #tpu.memory_space<vmem>>, vector<4x4xf32>
      %cst_16 = arith.constant dense<0xFF800000> : vector<4xf32>
      %20 = vector.multi_reduction <maximumf>, %19, %cst_16 [1] : vector<4x4xf32> to vector<4xf32>
      %21 = vector.shape_cast %20 : vector<4xf32> to vector<4x1xf32>
      %22 = vector.broadcast %21 : vector<4x1xf32> to vector<4x4xf32>
      %23 = arith.subf %19, %22 : vector<4x4xf32>
      %24 = math.exp %23 : vector<4x4xf32>
      %cst_17 = arith.constant dense<0.000000e+00> : vector<4xf32>
      %25 = vector.multi_reduction <add>, %24, %cst_17 [1] : vector<4x4xf32> to vector<4xf32>
      %26 = vector.shape_cast %25 : vector<4xf32> to vector<4x1xf32>
      %27 = tpu.reciprocal %26 : vector<4x1xf32> -> vector<4x1xf32>
      %28 = vector.broadcast %27 : vector<4x1xf32> to vector<4x4xf32>
      %29 = arith.mulf %24, %28 : vector<4x4xf32>
      %c0_18 = arith.constant 0 : index
      %c0_19 = arith.constant 0 : index
      %c0_20 = arith.constant 0 : index
      %30 = vector.load %arg5[%c0_18, %c0_19, %c0_20] : memref<1x4x4xf32, #tpu.memory_space<vmem>>, vector<1x4x4xf32>
      %31 = vector.shape_cast %30 : vector<1x4x4xf32> to vector<4x4xf32>
      %32 = vector.shape_cast %29 : vector<4x4xf32> to vector<1x4x4xf32>
      tpu.vector_store %arg5[%c0_18, %c0_19, %c0_20], %32 {strides = array<i32>} : memref<1x4x4xf32, #tpu.memory_space<vmem>>, vector<1x4x4xf32>,
    } else {
    }
    return
  }
  func.func @transform_0(%arg0: i32, %arg1: i32) -> (i32, i32, i32) {
    %c0_i32 = arith.constant 0 : i32
    %c0_i32_0 = arith.constant 0 : i32
    return %arg0, %c0_i32, %arg1 : i32, i32, i32
  }
  func.func @transform_1(%arg0: i32, %arg1: i32) -> (i32, i32) {
    %c0_i32 = arith.constant 0 : i32
    %c0_i32_0 = arith.constant 0 : i32
    %c0_i32_1 = arith.constant 0 : i32
    return %c0_i32, %c0_i32_0 : i32, i32
  }
  func.func @transform_2(%arg0: i32, %arg1: i32) -> (i32, i32) {
    %c0_i32 = arith.constant 0 : i32
    %c0_i32_0 = arith.constant 0 : i32
    %c0_i32_1 = arith.constant 0 : i32
    return %c0_i32, %c0_i32_0 : i32, i32
  }
  func.func @transform_3(%arg0: i32, %arg1: i32) -> (i32, i32, i32) {
    %c0_i32 = arith.constant 0 : i32
    %c0_i32_0 = arith.constant 0 : i32
    %c0_i32_1 = arith.constant 0 : i32
    return %arg0, %c0_i32, %c0_i32_0 : i32, i32, i32
  }
}

</mosaic_0001>

<bundles_post_ra>
// kernel: tpu_custom_call.1
= control target key start
LH: loop header
LB: loop body
LE: loop exit
PB: predicated region body
PF: predicated region fallthrough
CT: control target
= control target key end

     0   :  { %8 = vsyncpa [#allocation4], 0  ;;  %s775_s0 = inlined_call_operand.vmem [shape: f32[2,4,128], index: 0, kind: input, shape index: {}]   ;;  %s776_s1 = inlined_call_operand.vmem [shape: f32[8,4], index: 1, kind: input, shape index: {}]   ;;  %s777_s2 = inlined_call_operand.vmem [shape: f32[8,1], index: 2, kind: input, shape index: {}]   ;;  %s778_s3 = inlined_call_operand.hbm [shape: f32[2,4,4], index: 3, kind: output, shape index: {}]  }
   0x1   :  { %10 = vsyncpa [#allocation4 + $0x1], 0  ;;  %s652_s12 = smov 0   ;;  %s654_s13 = smov 0  }
   0x2   :  { %s656_s14 = smov 0   ;;  %s658_s15 = smov 0  }
   0x3   :  { %s660_s16 = smov 0   ;;  %s662_s17 = smov 0  }
   0x4 LB: > { %s458_s18 = sadd.s32 4294967295, %s626_s17   ;;  %s459_s19 = sadd.s32 4294967294, %s626_s17   ;;  %s626_s17 = sphi %s662_s17, %s16_s17   ;;  %s622_s16 = sphi %s660_s16, %s785_s16   ;;  %s618_s15 = sphi %s658_s15, %s784_s15   ;;  %s614_s14 = sphi %s656_s14, %s783_s14   ;;  %s610_s13 = sphi %s654_s13, %s782_s13   ;;  %s606_s12 = sphi %s652_s12, %s781_s12  }
   0x5   : > { %s28_s20 = sadd.s32 1, %s622_s16  ;;  %s105_s21 = sadd.s32 1, %s614_s14 }
   0x6   : > { %p30_p0 = scmp.ge.s32.totalorder %s28_s20, 2  ;;  %p115_p1 = scmp.ne.s32.totalorder %s614_s14, %s610_s13 }
   0x7   : > { %p116_p2 = scmp.eq.s32.totalorder %s458_s18, 1  ;;  %p121_p3 = scmp.ne.s32.totalorder %s610_s13, %s606_s12 }
   0x8   : > { %s787_s20 = smov (%p30_p0, %s28_s20), 0  ;;  %p122_p5 = scmp.eq.s32.totalorder %s459_s19, 1 }
   0x9   : > { %p692_p4 = por %p116_p2, %p115_p1  ;;  %s102_s23 = ssub.s32 %s622_s16, %s787_s20 }
   0xa   : > { %p462_p6 = scmp.ge.s32.totalorder %s626_s17, 1  ;;  %p103_p7 = scmp.eq.s32.totalorder %s102_s23, 0 }
   0xb   : > { %p699_p8 = por %p122_p5, %p121_p3  ;;  %p156_p9 = scmp.lt.s32.totalorder %s626_s17, 3 }
   0xc   : > { %s705_s25 = scalar_select %p103_p7, %s614_s14, %s105_s21  }
   0xd   : > { %p157_p10 = pnand %p462_p6, %p156_p9 }
   0xe   : > { %p182_p11 = scmp.lt.s32.totalorder (!%p157_p10), %s618_s15, 1  ;;  %v628_v0 = vmov (!%p157_p10), 0.0   ;;  %vm629_vm0 = vmmov (!%p157_p10), 0   ;;  %v197_v1 = vld [vmem:[%s777_s2] sm:$0xff] (!%p157_p10)  ;;  %v630_v2 = vmov (!%p157_p10), 0   ;;  %vm207_vm1 = vcmask (!%p157_p10), 1043456  }
   0xf   : > { %160 = sbr.rel (%p157_p10) target bundleno = 797 (0x31d), region = 32  ;;  %475 = vmatprep.subr.mxu0 (!%p157_p10), %v628_v0  ;;  %477 = vmatprep.mubr.msk.f32.mxu0 (!%p157_p10), %vm629_vm0, %v628_v0  ;;  %v196_v3 = vld [vmem:[%s776_s1] sm:$0xff] (!%p157_p10)  ;;  %vm203_vm2 = vcmask (!%p157_p10), 31744   ;;  %vm193_vm3 = vcmask (!%p157_p10), 27648   ;;  %s179_s8 = sand.u32 (!%p157_p10), 1, %s610_s13  }
  0x10   : > { %543 = vset.pattern.permute.xlu0 (!%p157_p10), %v630_v2  ;;  %480 = vmatprep.subr.mxu1 (!%p157_p10), %v628_v0  ;;  %194 = vst.msk [vmem:[#allocation2] sm:$0xf] (!%p157_p10), %vm193_vm3, %v628_v0  ;;  %s463_s9 = sshll.u32 (!%p157_p10), %s179_s8, 2  ;;  %s468_s10 = sshll.u32 (!%p157_p10), %s618_s15, 6 }
  0x11   : > { %200 = vperm.xlu0 (!%p157_p10), %543, %v197_v1   ;;  %482 = vmatprep.mubr.msk.f32.mxu1 (!%p157_p10), %vm629_vm0, %v628_v0  ;;  %s181_s11 = scalar_lea.vmem (!%p157_p10), [#allocation3], %s463_s9  ;;  %s727_s23 = scalar_lea.hbm (!%p157_p10), %s778_s3, %s468_s10 }
  0x12   : > { %s388_s18 = sshll.u32 (!%p157_p10), %s181_s11, 4  ;;  %s375_s26 = scalar_lea.sflag (!%p157_p10), [#allocation4], %s179_s8  ;;  %s729_s18 = int_to_ptr.vmem [resolvable:$true] %s388_s18 }
  0x13   : > { %s548_s27 = scalar_lea.vmem (!%p157_p10), %s729_s18, 64 }
  0x14   : > { %p549_p12 = scmp.ne.s32.totalorder (!%p157_p10), %s729_s18, %s548_s27 }
  0x16   : > { %s183_s28 = scalar_select %p182_p11, %s618_s15, 1 }
  0x17   : > { %v281_v10 = vld [vmem:[#allocation2] sm:$0xf]  ;;  %p550_p13 = pnand %p549_p12, %p692_p4  ;;  %s631_s15 = smov [#allocation3]  }
  0x18   : > { %s464_s29 = sshll.u32 %s183_s28, 2  ;;  %s552_s28 = sshll.u32 %s631_s15, 4  ;;  %s553_s28 = int_to_ptr.vmem [resolvable:$false] %s552_s28 }
  0x19   : > { %s188_s5 = scalar_lea.vmem %s775_s0, %s464_s29  ;;  %p551_p0 = pneg %p550_p13 }
  0x1a   : > { %v195_v4 = vld [vmem:[%s188_s5] sm:$0xf]  ;;  %s554_s29 = scalar_lea.vmem %s553_s28, 128  ;;  %p555_p1 = scmp.lt.s32.totalorder %s729_s18, %s553_s28 }
  0x1b   : > { %476 = vmatpush3.msk.msra.mxu0 %vm207_vm1, %v195_v4  ;;  %p556_p2 = scmp.lt.s32.totalorder %s554_s29, %s548_s27 }
  0x1c   : > { %478 = vmatmul.mubr.msk.f32.vlgmr.msra.gmra.mrb[0].mxu0 %vm203_vm2, %v196_v3 }
  0x1d   : > { %p557_p3 = por %p556_p2, %p555_p1 }
  0x1f   : > { %p558_p5 = pnand %p557_p3, %p551_p0 }
  0x90   : > { %v201_v5 = vpop.permute.xlu0 %200 }
  0xef   : > { %v277_v6 = vpop.f32.mrb[0].mxu0 }
  0xf0   : > { %v278_v7 = vadd.f32 %v277_v6, %v201_v5  ;;  %v479_v8 = vpop.f32.mrb[1].mxu0 }
  0xf2   : > { %v283_v9 = vrot.slane %v278_v7, 4 }
  0xf4   : > { %481 = vmatpush3.xpose.msra.mxu1 %v283_v9 }
  0xf7   : > { %483 = vmatmul.mubr.f32.vlgmr.msra.gmra.mrb[0].mxu1 %v278_v7 }
 0x1ca   : > { %v351_v11 = vpop.f32.mrb[0].mxu1 }
 0x1cb   : > { %v355_v12 = vadd.f32 %v351_v11, %v281_v10  ;;  %v484_v13 = vpop.f32.mrb[1].mxu1 }
 0x1cd   : > { %357 = vst.msk [vmem:[#allocation2] sm:$0xf] %vm193_vm3, %v355_v12 }
 0x1d4   : > { %v361_v14 = vld [vmem:[#allocation2] sm:$0xf] }
 0x1d5   : > { %v362_v15 = vsel %vm193_vm3, %v361_v14, -inf }
 0x1d6   : > { %363 = vmax.xlane.f32.xlu0 %v362_v15 }
 0x263   : > { %v364_v16 = vpop.xlane.xlu0 %363 }
 0x264   : > { %v365_v17 = vsub.f32 %v361_v14, %v364_v16 }
 0x266   : > { %v366_v18 = vmul.f32 1.442695, %v365_v17 }
 0x268   : > { %544 = vpow2.f32 %v366_v18 }
 0x272   : > { %v545_v19 = vpop.eup %544 }
 0x273   : > { %v368_v20 = vsel %vm193_vm3, %v545_v19, 0.0 }
 0x274   : > { %369 = vadd.xlane.f32.xlu1 %v368_v20 }
 0x301   : > { %v370_v21 = vpop.xlane.xlu1 %369 }
 0x302   : > { %546 = vrcp.f32 %v370_v21 }
 0x30c   : > { %v547_v22 = vpop.eup %546 }
 0x30d   : > { %v372_v23 = vmul.f32 %v547_v22, %v545_v19 }
 0x30f   : > { %373 = vst.msk [vmem:[%s181_s11] sm:$0xf] %vm193_vm3, %v372_v23 }
 0x310   : > { %561 = shalt.err (!%p558_p5)
}
 0x311   : > { %s562_s30 = scalar_lea.hbm %s727_s23, 64  ;;  %s566_s6 = scalar_lea.hbm %s778_s3, 128 }
 0x312   : > { %p563_p6 = scmp.ne.s32.totalorder %s727_s23, %s562_s30  ;;  %p567_p10 = scmp.lt.u32.totalorder %s727_s23, %s778_s3 }
 0x313   : > { %p568_p11 = scmp.lt.u32.totalorder %s566_s6, %s562_s30  ;;  %p570_p13 = scmp.lt.u32.totalorder %s562_s30, %s727_s23 }
 0x314   : > { %p564_p7 = pnand %p563_p6, %p692_p4 }
 0x315   : > { %p569_p12 = por %p568_p11, %p567_p10 }
 0x316   : > { %p565_p9 = pneg %p564_p7 }
 0x317   : > { %p571_p0 = por %p570_p13, %p569_p12 }
 0x319   : > { %p572_p1 = pnand %p571_p0, %p565_p9 }
 0x31b   : > { %575 = shalt.err (!%p572_p1)
}
 0x31c   : > { %485 = dma.vmem_to_hbm [thread:$0]  (%p692_p4), %s729_s18, 64, %s727_s23, %s375_s26  }
 0x31d PF: > { %p491_p2 = scmp.ge.s32.totalorder %s626_s17, 2  ;;  %s400_s9 = sand.u32 1, %s606_s12  }
 0x31e   : > { %s401_s10 = scalar_lea.sflag [#allocation4], %s400_s9 }
 0x31f   : > { %p488_p3 = pnand %p491_p2, %p699_p8 }
 0x321   : > { %601 = dma.done.wait (!%p488_p3), %s401_s10, 64  }
 0x322   : > { %603 = vsyncadd (!%p488_p3), %s401_s10, 4294967232  ;;  %s16_s17 = sadd.s32 1, %s626_s17   ;;  %s781_s12 = smov %s610_s13 }
 0x323   : > { %p13_p5 = scmp.ge.s32.totalorder %s16_s17, 4   ;;  %s782_s13 = smov %s614_s14 }
 0x324   : > { %s783_s14 = smov %s705_s25  ;;  %s784_s15 = smov %s622_s16 }
 0x325   : > { %s785_s16 = smov %s787_s20  ;;  %15 = sbr.rel (!%p13_p5) target bundleno = 4 (0x4), region = 75 }
 0x32c   :  { %406 = vsyncpa [#allocation4], 1 }
 0x32d   :  { %408 = vsyncpa [#allocation4 + $0x1], 1 }

</bundles_post_ra>
